<compile_context>
chip_gen: v6e
topology: v6e:2x2x1
jax: 0.10.0
libtpu: 0.0.40
codegen_flags: <defaults>
</compile_context>

<pallas_src>
import functools

import jax
import jax.numpy as jnp
from jax.experimental import pallas as pl
from jax.experimental.pallas import tpu as pltpu


def _label_smoothing_kernel(pred_ref, tgt_ref, out_ref, acc_ref, *,
                            smoothing_value, confidence, total_batch,
                            lane_tile, needs_mask):
    i = pl.program_id(0)

    @pl.when(i == 0)
    def _():
        acc_ref[...] = jnp.zeros_like(acc_ref)

    # Lane-dense layout: classes on sublanes (axis 0), batch on lanes (axis 1).
    logits = pred_ref[...].astype(jnp.float32)                         # (C, tb)
    tgt = tgt_ref[...]                                                 # (1, tb)

    # Numerically stable log-softmax statistics along the class (sublane) axis.
    m = jnp.max(logits, axis=0, keepdims=True)                         # (1, tb)
    shifted = logits - m                                               # (C, tb)
    lse = jnp.log(jnp.sum(jnp.exp(shifted), axis=0, keepdims=True))    # (1, tb)

    # Fused smoothed-target expectation:
    #   loss_i = lse_i - sum_c w_c * shifted_{c,i},
    #   w_c = confidence if c == target_i else smoothing/(C-1)
    cls_idx = jax.lax.broadcasted_iota(jnp.int32, logits.shape, 0)     # (C, tb)
    w = jnp.where(cls_idx == tgt,
                  jnp.float32(confidence), jnp.float32(smoothing_value))
    expected = jnp.sum(w * shifted, axis=0, keepdims=True)             # (1, tb)

    loss = lse - expected                                              # (1, tb)

    if needs_mask:
        # Ragged last tile: out-of-bounds lanes hold garbage -> select to 0.
        col = jax.lax.broadcasted_iota(jnp.int32, loss.shape, 1) + i * lane_tile
        loss = jnp.where(col < total_batch, loss, 0.0)

    acc_ref[...] += loss

    @pl.when(i == pl.num_programs(0) - 1)
    def _():
        total = jnp.sum(acc_ref[...], axis=(0, 1), keepdims=True)      # (1, 1)
        out_ref[...] = total * jnp.float32(1.0 / total_batch)


def label_smoothing_loss(pred, target, *, classes=10, smoothing=0.1,
                         lane_tile=8192):
    """pred: [B, C] float logits, target: [B] int class ids -> scalar loss."""
    assert pred.ndim == 2 and pred.shape[1] == classes
    assert lane_tile % 128 == 0
    B, C = pred.shape
    confidence = 1.0 - smoothing
    smoothing_value = smoothing / (classes - 1)

    # Lane-dense relayout: batch on the 128-lane axis, classes on sublanes.
    pred_t = pred.T                                       # (C, B)
    tgt_row = target.astype(jnp.int32).reshape(1, B)      # (1, B)

    if B <= lane_tile:
        tb = B                       # single full-extent tile, no 128 alignment needed
        grid = (1,)
        needs_mask = False
    else:
        tb = lane_tile               # multiple of 128 -> lane-dense, unmasked DMAs
        grid = (pl.cdiv(B, tb),)
        needs_mask = (B % tb) != 0   # ragged tail handled in-kernel, no jnp.pad copy

    kernel = functools.partial(
        _label_smoothing_kernel,
        smoothing_value=float(smoothing_value),
        confidence=float(confidence),
        total_batch=B,
        lane_tile=tb,
        needs_mask=needs_mask,
    )

    out = pl.pallas_call(
        kernel,
        out_shape=jax.ShapeDtypeStruct((1, 1), jnp.float32),
        grid_spec=pltpu.PrefetchScalarGridSpec(
            num_scalar_prefetch=0,
            grid=grid,
            in_specs=[
                pl.BlockSpec((C, tb), lambda i: (0, i)),   # logits: classes x batch-tile
                pl.BlockSpec((1, tb), lambda i: (0, i)),   # targets: lane-dense row
            ],
            out_specs=pl.BlockSpec((1, 1), lambda i: (0, 0)),
            scratch_shapes=[pltpu.VMEM((1, tb), jnp.float32)],  # per-lane accumulator
        ),
        compiler_params=pltpu.CompilerParams(
            dimension_semantics=("arbitrary",),
        ),
    )(pred_t, tgt_row)
    return out[0, 0]


def _reference(pred, target, classes=10, smoothing=0.1):
    confidence = 1.0 - smoothing
    logp = jax.nn.log_softmax(pred.astype(jnp.float32), axis=-1)
    B, C = pred.shape
    true_dist = jnp.full((B, C), smoothing / (classes - 1), jnp.float32)
    true_dist = true_dist.at[jnp.arange(B), target].set(confidence)
    return jnp.mean(jnp.sum(-true_dist * logp, axis=-1))


if __name__ == "__main__":
    key = jax.random.PRNGKey(0)
    k1, k2, k3, k4 = jax.random.split(key, 4)

    # Small case matching the module default (classes=10): single batch tile.
    B, C = 8, 10
    pred = jax.random.normal(k1, (B, C), dtype=jnp.float32)
    target = jax.random.randint(k2, (B,), 0, C, dtype=jnp.int32)
    loss = jax.block_until_ready(
        label_smoothing_loss(pred, target, classes=C, smoothing=0.1))
    ref = _reference(pred, target, classes=C, smoothing=0.1)
    assert jnp.allclose(loss, ref, atol=1e-5, rtol=1e-5), (loss, ref)

    # Multi-tile + ragged-tail path (small lane_tile just to exercise the
    # pipelined grid and the in-kernel boundary mask at small shapes).
    B2 = 300
    pred2 = jax.random.normal(k3, (B2, C), dtype=jnp.float32)
    target2 = jax.random.randint(k4, (B2,), 0, C, dtype=jnp.int32)
    loss2 = jax.block_until_ready(
        label_smoothing_loss(pred2, target2, classes=C, smoothing=0.1,
                             lane_tile=128))
    ref2 = _reference(pred2, target2, classes=C, smoothing=0.1)
    assert jnp.allclose(loss2, ref2, atol=1e-5, rtol=1e-5), (loss2, ref2)

    print("KERNEL_OK")
</pallas_src>

<mosaic_0001>
module attributes {stable_mosaic.version = 11 : i64} {
  func.func @_label_smoothing_kernel(%arg0: i32, %arg1: memref<10x8xf32, #tpu.memory_space<vmem>>, %arg2: memref<1x8xi32, #tpu.memory_space<vmem>>, %arg3: memref<1x1xf32, #tpu.memory_space<vmem>>, %arg4: memref<1x8xf32, #tpu.memory_space<vmem>>) attributes {dimension_semantics = [#tpu.dimension_semantics<arbitrary>], iteration_bounds = array<i64: 1>, scalar_prefetch = 0 : i64, scratch_operands = 1 : i64, tpu.core_type = #tpu.core_type<tc>, window_params = [{transform_indices = @transform_0, window_bounds = array<i64: 10, 8>}, {transform_indices = @transform_1, window_bounds = array<i64: 1, 8>}, {pipeline_mode = #tpu.pipeline_mode<synchronous>, transform_indices = @transform_2, window_bounds = array<i64: 1, 1>}]} {
    %c0_i32 = arith.constant 0 : i32
    %0 = arith.cmpi eq, %arg0, %c0_i32 : i32
    %1 = arith.extui %0 : i1 to i32
    %c0_i32_0 = arith.constant 0 : i32
    %2 = arith.cmpi ne, %1, %c0_i32_0 : i32
    scf.if %2 {
      %cst_14 = arith.constant 0.000000e+00 : f32
      %29 = vector.broadcast %cst_14 : f32 to vector<1x8xf32>
      %c0_15 = arith.constant 0 : index
      %c0_16 = arith.constant 0 : index
      %30 = vector.load %arg4[%c0_15, %c0_16] : memref<1x8xf32, #tpu.memory_space<vmem>>, vector<1x8xf32>
      tpu.vector_store %arg4[%c0_15, %c0_16], %29 {strides = array<i32>} : memref<1x8xf32, #tpu.memory_space<vmem>>, vector<1x8xf32>,
    } else {
    }
    %c0 = arith.constant 0 : index
    %c0_1 = arith.constant 0 : index
    %3 = vector.load %arg1[%c0, %c0_1] : memref<10x8xf32, #tpu.memory_space<vmem>>, vector<10x8xf32>
    %c0_2 = arith.constant 0 : index
    %c0_3 = arith.constant 0 : index
    %4 = vector.load %arg2[%c0_2, %c0_3] : memref<1x8xi32, #tpu.memory_space<vmem>>, vector<1x8xi32>
    %cst = arith.constant dense<0xFF800000> : vector<8xf32>
    %5 = vector.multi_reduction <maximumf>, %3, %cst [0] : vector<10x8xf32> to vector<8xf32>
    %6 = vector.shape_cast %5 : vector<8xf32> to vector<1x8xf32>
    %7 = vector.broadcast %6 : vector<1x8xf32> to vector<10x8xf32>
    %8 = arith.subf %3, %7 : vector<10x8xf32>
    %9 = math.exp %8 : vector<10x8xf32>
    %cst_4 = arith.constant dense<0.000000e+00> : vector<8xf32>
    %10 = vector.multi_reduction <add>, %9, %cst_4 [0] : vector<10x8xf32> to vector<8xf32>
    %11 = vector.shape_cast %10 : vector<8xf32> to vector<1x8xf32>
    %12 = math.log %11 : vector<1x8xf32>
    %13 = tpu.iota {dimensions = array<i32: 0>} : vector<10x8xi32>
    %14 = vector.broadcast %4 : vector<1x8xi32> to vector<10x8xi32>
    %15 = arith.cmpi eq, %13, %14 : vector<10x8xi32>
    %cst_5 = arith.constant 0.899999976 : f32
    %cst_6 = arith.constant 0.0111111114 : f32
    %16 = vector.broadcast %cst_5 : f32 to vector<10x8xf32>
    %17 = vector.broadcast %cst_6 : f32 to vector<10x8xf32>
    %18 = arith.select %15, %16, %17 : vector<10x8xi1>, vector<10x8xf32>
    %19 = arith.mulf %18, %8 : vector<10x8xf32>
    %cst_7 = arith.constant dense<0.000000e+00> : vector<8xf32>
    %20 = vector.multi_reduction <add>, %19, %cst_7 [0] : vector<10x8xf32> to vector<8xf32>
    %21 = vector.shape_cast %20 : vector<8xf32> to vector<1x8xf32>
    %22 = arith.subf %12, %21 : vector<1x8xf32>
    %c0_8 = arith.constant 0 : index
    %c0_9 = arith.constant 0 : index
    %23 = vector.load %arg4[%c0_8, %c0_9] : memref<1x8xf32, #tpu.memory_space<vmem>>, vector<1x8xf32>
    %24 = arith.addf %23, %22 : vector<1x8xf32>
    %c0_10 = arith.constant 0 : index
    %c0_11 = arith.constant 0 : index
    %25 = vector.load %arg4[%c0_10, %c0_11] : memref<1x8xf32, #tpu.memory_space<vmem>>, vector<1x8xf32>
    tpu.vector_store %arg4[%c0_10, %c0_11], %24 {strides = array<i32>} : memref<1x8xf32, #tpu.memory_space<vmem>>, vector<1x8xf32>,
    %c0_i32_12 = arith.constant 0 : i32
    %26 = arith.cmpi eq, %arg0, %c0_i32_12 : i32
    %27 = arith.extui %26 : i1 to i32
    %c0_i32_13 = arith.constant 0 : i32
    %28 = arith.cmpi ne, %27, %c0_i32_13 : i32
    scf.if %28 {
      %c0_14 = arith.constant 0 : index
      %c0_15 = arith.constant 0 : index
      %29 = vector.load %arg4[%c0_14, %c0_15] : memref<1x8xf32, #tpu.memory_space<vmem>>, vector<1x8xf32>
      %30 = vector.shape_cast %29 : vector<1x8xf32> to vector<1x1x8xf32>
      %cst_16 = arith.constant dense<0.000000e+00> : vector<1xf32>
      %31 = vector.multi_reduction <add>, %30, %cst_16 [1, 2] : vector<1x1x8xf32> to vector<1xf32>
      %32 = vector.shape_cast %31 : vector<1xf32> to vector<1x1x1xf32>
      %33 = vector.extract %32[0, 0, 0] : f32 from vector<1x1x1xf32>
      %34 = vector.broadcast %33 : f32 to vector<1x1xf32>
      %cst_17 = arith.constant 1.250000e-01 : f32
      %35 = vector.broadcast %cst_17 : f32 to vector<1x1xf32>
      %36 = arith.mulf %34, %35 : vector<1x1xf32>
      %c0_18 = arith.constant 0 : index
      %c0_19 = arith.constant 0 : index
      %37 = vector.load %arg3[%c0_18, %c0_19] : memref<1x1xf32, #tpu.memory_space<vmem>>, vector<1x1xf32>
      tpu.vector_store %arg3[%c0_18, %c0_19], %36 {strides = array<i32>} : memref<1x1xf32, #tpu.memory_space<vmem>>, vector<1x1xf32>,
    } else {
    }
    return
  }
  func.func @transform_0(%arg0: i32) -> (i32, i32) {
    %c0_i32 = arith.constant 0 : i32
    %c0_i32_0 = arith.constant 0 : i32
    return %c0_i32, %arg0 : i32, i32
  }
  func.func @transform_1(%arg0: i32) -> (i32, i32) {
    %c0_i32 = arith.constant 0 : i32
    %c0_i32_0 = arith.constant 0 : i32
    return %c0_i32, %arg0 : i32, i32
  }
  func.func @transform_2(%arg0: i32) -> (i32, i32) {
    %c0_i32 = arith.constant 0 : i32
    %c0_i32_0 = arith.constant 0 : i32
    %c0_i32_1 = arith.constant 0 : i32
    return %c0_i32, %c0_i32_0 : i32, i32
  }
}

</mosaic_0001>

<bundles_post_ra>
// kernel: tpu_custom_call.1
= control target key start
LH: loop header
LB: loop body
LE: loop exit
PB: predicated region body
PF: predicated region fallthrough
CT: control target
= control target key end

     0   :  { %vm16_vm0 = vcmask 57344   ;;  %vm21_vm1 = vcmask 64512   ;;  %v142_v2 = vmov 0.0   ;;  %vm23_vm2 = vcmask 58368   ;;  %s181_s0 = inlined_call_operand.vmem [shape: f32[10,8], index: 0, kind: input, shape index: {}]   ;;  %s182_s1 = inlined_call_operand.vmem [shape: s32[1,8], index: 1, kind: input, shape index: {}]   ;;  %s183_s2 = inlined_call_operand.hbm [shape: f32[1,1], index: 2, kind: output, shape index: {}]  }
   0x1   :  { %v18_v0 = vld [vmem:[%s181_s0] sm:$0xff]  ;;  %v19_v1 = vld [vmem:[%s181_s0 + $0x8] sm:$0x3]  ;;  %17 = vst.msk [vmem:[#allocation2] sm:$0x1] %vm16_vm0, %v142_v2 }
   0x2   :  { %v22_v3 = vsel %vm21_vm1, %v18_v0, -inf  ;;  %v24_v4 = vsel %vm23_vm2, %v19_v1, -inf }
   0x3   :  { %7 = vsyncpa [#allocation4], 0  ;;  %v25_v5 = vmax.f32 %v22_v3, %v24_v4  ;;  %v49_v11 = vlaneseq  ;;  %v108_v19 = vld [vmem:[%s182_s1] ss:$0 sm:$0xff]  ;;  %v143_v20 = vmov 0.011111111  }
   0x4   :  { %s144_s1 = smov [#allocation3]   ;;  %vm92_vm5 = vcmask 0  }
   0x5   :  { %v26_v6 = vrot.slane %v25_v5, 4  ;;  %v50_v15 = vshrl.u32 %v49_v11, 7  ;;  %s100_s14 = sshll.u32 %s144_s1, 4  ;;  %s101_s14 = int_to_ptr.vmem [resolvable:$true] %s100_s14 }
   0x6   :  { %s120_s16 = scalar_lea.vmem %s101_s14, 16  ;;  %s124_s17 = scalar_lea.vmem %s101_s14, 32 }
   0x7   :  { %v27_v7 = vmax.f32 %v25_v5, %v26_v6  ;;  %v51_v18 = vadd.s32 8, %v50_v15  ;;  %vm56_vm3 = vcmp.eq.s32.totalorder %v50_v15, %v108_v19  ;;  %p121_p0 = scmp.ne.s32.totalorder %s101_s14, %s120_s16  ;;  %p125_p1 = scmp.lt.s32.totalorder %s101_s14, %s101_s14 }
   0x8   :  { %v58_v21 = vsel %vm56_vm3, 0.9, %v143_v20  ;;  %v72_v47 = vld [vmem:[#allocation2] sm:$0x1]  ;;  %p126_p2 = scmp.lt.s32.totalorder %s124_s17, %s120_s16 }
   0x9   :  { %v28_v8 = vrot.slane %v27_v7, 2  ;;  %vm57_vm4 = vcmp.eq.s32.totalorder %v51_v18, %v108_v19 }
   0xa   :  { %v59_v22 = vsel %vm57_vm4, 0.9, %v143_v20  ;;  %p127_p3 = por %p126_p2, %p125_p1 }
   0xb   :  { %v29_v9 = vmax.f32 %v27_v7, %v28_v8 }
   0xc   :  { %p128_p4 = pnand %p127_p3, %p121_p0 }
   0xd   :  { %v30_v10 = vrot.slane %v29_v9, 1 }
   0xf   :  { %v31_v12 = vmax.f32 %v29_v9, %v30_v10 }
  0x11   :  { %v32_v13 = vsub.f32 %v18_v0, %v31_v12  ;;  %v33_v14 = vsub.f32 %v19_v1, %v31_v12 }
  0x13   :  { %v34_v16 = vmul.f32 1.442695, %v32_v13  ;;  %v36_v17 = vmul.f32 1.442695, %v33_v14  ;;  %v60_v23 = vmul.f32 %v58_v21, %v32_v13  ;;  %v61_v24 = vmul.f32 %v59_v22, %v33_v14 }
  0x15   :  { %114 = vpow2.f32 %v34_v16  ;;  %v62_v29 = vsel %vm21_vm1, %v60_v23, 0.0  ;;  %v63_v30 = vsel %vm23_vm2, %v61_v24, 0.0 }
  0x16   :  { %116 = vpow2.f32 %v36_v17  ;;  %v64_v33 = vadd.f32 %v63_v30, %v62_v29 }
  0x18   :  { %v65_v36 = vrot.slane %v64_v33, 4 }
  0x1a   :  { %v66_v39 = vadd.f32 %v65_v36, %v64_v33 }
  0x1c   :  { %v67_v41 = vrot.slane %v66_v39, 2 }
  0x1e   :  { %v68_v42 = vadd.f32 %v67_v41, %v66_v39 }
  0x20   :  { %v69_v43 = vrot.slane %v68_v42, 1 }
  0x22   :  { %v115_v25 = vpop.eup %114  ;;  %v70_v44 = vadd.f32 %v69_v43, %v68_v42 }
  0x23   :  { %v117_v26 = vpop.eup %116  ;;  %v38_v27 = vsel %vm21_vm1, %v115_v25, 0.0 }
  0x24   :  { %v39_v28 = vsel %vm23_vm2, %v117_v26, 0.0 }
  0x25   :  { %v40_v31 = vadd.f32 %v39_v28, %v38_v27 }
  0x27   :  { %v41_v32 = vrot.slane %v40_v31, 4 }
  0x29   :  { %v42_v34 = vadd.f32 %v41_v32, %v40_v31 }
  0x2b   :  { %v43_v35 = vrot.slane %v42_v34, 2 }
  0x2d   :  { %v44_v37 = vadd.f32 %v43_v35, %v42_v34 }
  0x2f   :  { %v45_v38 = vrot.slane %v44_v37, 1 }
  0x31   :  { %v46_v40 = vadd.f32 %v45_v38, %v44_v37 }
  0x33   :  { %118 = vlog2.f32 %v46_v40 }
  0x40   :  { %v119_v45 = vpop.eup %118 }
  0x41   :  { %v48_v46 = vmul.f32 0.6931472, %v119_v45 }
  0x43   :  { %v71_v48 = vsub.f32 %v48_v46, %v70_v44 }
  0x45   :  { %v73_v49 = vadd.f32 %v72_v47, %v71_v48 }
  0x47   :  { %75 = vst.msk [vmem:[#allocation2] sm:$0x1] %vm16_vm0, %v73_v49 }
  0x4e   :  { %v79_v50 = vld [vmem:[#allocation2] sm:$0x1] }
  0x4f   :  { %v80_v51 = vsel %vm16_vm0, %v79_v50, 0.0 }
  0x50   :  { %81 = vadd.xlane.f32.xlu0 %v80_v51 }
  0xd9   :  { %v82_v52 = vpop.xlane.xlu0 %81 }
  0xda   :  { %v83_v53 = vrot.slane %v82_v52, 4 }
  0xdc   :  { %v84_v54 = vadd.f32 %v83_v53, %v82_v52 }
  0xde   :  { %v85_v55 = vrot.slane %v84_v54, 2 }
  0xe0   :  { %v86_v56 = vadd.f32 %v85_v55, %v84_v54 }
  0xe2   :  { %v87_v57 = vrot.slane %v86_v56, 1 }
  0xe4   :  { %v88_v58 = vadd.f32 %v87_v57, %v86_v56 }
  0xe6   :  { %109 = vpush %v88_v58 }
 0x117   :  { %s110_s15 = spop %109 }
 0x118   :  { %v90_v59 = vstv %s110_s15 }
 0x119   :  { %v91_v60 = vmul.f32 0.125, %v90_v59 }
 0x11b   :  { %93 = vst.msk [vmem:[#allocation3] sm:$0x1] %vm92_vm5, %v91_v60 }
 0x11c   :  { %131 = shalt.err (!%p128_p4)
}
 0x11d   :  { %103 = dma.vmem_to_hbm [thread:$0]  %s101_s14, 16, %s183_s2, [#allocation4]  }
 0x11e   :  { %140 = dma.done.wait [#allocation4], 16  }
 0x11f   :  { %141 = vsyncadd [#allocation4], 4294967280 }
 0x120   :  { %107 = vsyncpa [#allocation4], 1 }

</bundles_post_ra>
